<compile_context>
chip_gen: v7x
topology: tpu7x:2x2x1
jax: 0.10.0
libtpu: 0.0.40
codegen_flags: <defaults>
</compile_context>

<pallas_src>
import jax
import jax.numpy as jnp
from jax.experimental import pallas as pl
from jax.experimental.pallas import tpu as pltpu

BN_EPS = 1e-5
LANE = 128


def _round_up(n, m):
    return ((n + m - 1) // m) * m


def _make_mlp_kernel(num_layers, matmul_dtype):
    """Fused MLP forward: all Linear + BatchNorm1d (+ ReLU) layers in one kernel."""

    def kernel(*refs):
        # refs = [x, (w, gamma, beta) * num_layers, out]   (bias dropped: cancelled by BN)
        x_ref = refs[0]
        o_ref = refs[-1]
        h_mm = x_ref[...]                                        # already matmul_dtype
        h = None
        for li in range(num_layers):
            w_ref, g_ref, beta_ref = refs[1 + 3 * li: 1 + 3 * (li + 1)]
            # Linear (MXU, bf16 operands, f32 accumulation). No bias: it is exactly
            # cancelled by the training-mode BN mean subtraction that follows.
            h = jnp.dot(h_mm, w_ref[...], preferred_element_type=jnp.float32)
            # BatchNorm1d (training-mode batch stats, biased variance), folded into one
            # scale/shift.  Single pass: var = E[h^2] - mean^2.
            mean = jnp.mean(h, axis=0, keepdims=True)            # (1, F)
            meansq = jnp.mean(h * h, axis=0, keepdims=True)      # (1, F)
            var = jnp.maximum(meansq - mean * mean, 0.0)
            s = g_ref[...] * jax.lax.rsqrt(var + BN_EPS)         # (1, F)  rsqrt -> EUP
            t = beta_ref[...] - mean * s                         # (1, F)
            h = h * s + t                                        # 2 VPU ops / element
            # Dropout(p=0.01) -> identity (see TODO above)
            if li < num_layers - 1:
                h = jnp.maximum(h, 0.0)                          # ReLU (popped for last layer)
                h_mm = h.astype(matmul_dtype)                    # next matmul operand
        o_ref[...] = h.astype(o_ref.dtype)

    return kernel


def mlp_forward(x, params, matmul_dtype=jnp.bfloat16):
    """x: (B, input_size) float32.  params: list of (W(in,out), b, gamma, beta).

    Feature dims are zero-padded to multiples of 128 (lane width); padded gamma/beta are
    zero so padded columns stay exactly zero through BN/ReLU and never contaminate real
    columns.  Batch is left unpadded so BN batch statistics are exact.
    """
    num_layers = len(params)
    B, K0 = x.shape
    out_dtype = x.dtype
    dims = [K0] + [w.shape[1] for (w, _, _, _) in params]
    pdims = [_round_up(d, LANE) for d in dims]

    # Pad + pack inputs (bias is intentionally NOT passed to the kernel).
    # x is pre-cast to the matmul dtype: identical arithmetic, half the DMA bytes.
    x_p = jnp.pad(x, ((0, 0), (0, pdims[0] - K0))).astype(matmul_dtype)
    flat_inputs = [x_p]
    for li, (w, b, g, beta) in enumerate(params):
        kp, np_ = pdims[li], pdims[li + 1]
        w_p = jnp.pad(w, ((0, kp - w.shape[0]), (0, np_ - w.shape[1]))).astype(matmul_dtype)
        g_p = jnp.pad(g, (0, np_ - g.shape[0])).reshape(1, np_).astype(jnp.float32)
        beta_p = jnp.pad(beta, (0, np_ - beta.shape[0])).reshape(1, np_).astype(jnp.float32)
        flat_inputs.extend([w_p, g_p, beta_p])

    def full_spec(arr):
        ndim = arr.ndim
        return pl.BlockSpec(arr.shape, lambda i, n=ndim: (0,) * n)

    in_specs = [full_spec(a) for a in flat_inputs]
    out_specs = pl.BlockSpec((B, pdims[-1]), lambda i: (0, 0))

    # Advisory cost estimate for XLA's scheduler.
    mm_flops = 2 * B * sum(pdims[i] * pdims[i + 1] for i in range(num_layers))
    ew_flops = 8 * B * sum(pdims[1:])
    transcendentals = sum(pdims[1:])  # one rsqrt per feature per layer
    bytes_accessed = (sum(int(a.size) * a.dtype.itemsize for a in flat_inputs)
                      + B * pdims[-1] * jnp.dtype(out_dtype).itemsize)

    out_p = pl.pallas_call(
        _make_mlp_kernel(num_layers, matmul_dtype),
        out_shape=jax.ShapeDtypeStruct((B, pdims[-1]), out_dtype),
        grid=(1,),
        in_specs=in_specs,
        out_specs=out_specs,
        compiler_params=pltpu.CompilerParams(
            dimension_semantics=("arbitrary",),
            vmem_limit_bytes=32 * 1024 * 1024),
        cost_estimate=pl.CostEstimate(
            flops=int(mm_flops + ew_flops),
            transcendentals=int(transcendentals),
            bytes_accessed=int(bytes_accessed)),
    )(*flat_inputs)

    return out_p[:, :dims[-1]]


def init_mlp_params(key, input_size, hidden_sizes, output_size):
    """Deterministic synthetic init (same shapes as the PyTorch module)."""
    hs = [input_size] + list(hidden_sizes) + [output_size]
    params = []
    for h0, h1 in zip(hs, hs[1:]):
        key, kw, kb, kg, kbe = jax.random.split(key, 5)
        bound = 1.0 / jnp.sqrt(h0)
        w = jax.random.uniform(kw, (h0, h1), jnp.float32, -bound, bound)
        b = jax.random.uniform(kb, (h1,), jnp.float32, -bound, bound)
        gamma = 1.0 + 0.1 * jax.random.normal(kg, (h1,), jnp.float32)
        beta = 0.1 * jax.random.normal(kbe, (h1,), jnp.float32)
        params.append((w, b, gamma, beta))
    return params


def mlp_reference_f32(x, params):
    """PyTorch-faithful reference: f32 matmul WITH bias, two-pass BN."""
    h = x.astype(jnp.float32)
    n = len(params)
    for li, (w, b, g, beta) in enumerate(params):
        h = h @ w + b[None, :]
        mean = jnp.mean(h, axis=0, keepdims=True)
        var = jnp.mean((h - mean) ** 2, axis=0, keepdims=True)
        h = (h - mean) / jnp.sqrt(var + BN_EPS) * g[None, :] + beta[None, :]
        if li < n - 1:
            h = jnp.maximum(h, 0.0)
    return h.astype(x.dtype)


def mlp_reference_kernel_math(x, params, matmul_dtype=jnp.bfloat16):
    """Pure-JAX mirror of the kernel arithmetic (no bias, bf16 matmul, folded BN)."""
    h = x.astype(jnp.float32)
    n = len(params)
    for li, (w, b, g, beta) in enumerate(params):
        h = jnp.dot(h.astype(matmul_dtype), w.astype(matmul_dtype),
                    preferred_element_type=jnp.float32)
        mean = jnp.mean(h, axis=0, keepdims=True)
        var = jnp.maximum(jnp.mean(h * h, axis=0, keepdims=True) - mean * mean, 0.0)
        s = g[None, :] * jax.lax.rsqrt(var + BN_EPS)
        t = beta[None, :] - mean * s
        h = h * s + t
        if li < n - 1:
            h = jnp.maximum(h, 0.0)
    return h.astype(x.dtype)


if __name__ == "__main__":
    input_size = 16
    hidden_sizes = [32, 64]
    output_size = 8
    batch = 8

    key = jax.random.PRNGKey(0)
    key_x, key_p = jax.random.split(key)
    x = jax.random.normal(key_x, (batch, input_size), jnp.float32)
    params = init_mlp_params(key_p, input_size, hidden_sizes, output_size)

    out = mlp_forward(x, params)
    out = jax.block_until_ready(out)
    assert out.shape == (batch, output_size), out.shape

    # Tight check against a pure-JAX mirror of the kernel's exact arithmetic.
    ref_exact = mlp_reference_kernel_math(x, params)
    err_exact = jnp.max(jnp.abs(out - ref_exact))
    assert jnp.allclose(out, ref_exact, atol=1e-4, rtol=1e-4), f"max abs err {err_exact}"

    # Loose check against the PyTorch-faithful f32 reference (bias + two-pass BN);
    # the only deviations are bf16 matmul rounding and the BN algebraic refactoring.
    ref_f32 = mlp_reference_f32(x, params)
    err_f32 = jnp.max(jnp.abs(out - ref_f32))
    assert jnp.allclose(out, ref_f32, atol=1e-1, rtol=1e-1), f"max abs err vs f32 ref {err_f32}"

    print("KERNEL_OK")
</pallas_src>

<mosaic_0001>
module attributes {stable_mosaic.version = 11 : i64} {
  func.func @kernel(%arg0: i32, %arg1: memref<8x128xbf16, #tpu.memory_space<vmem>>, %arg2: memref<128x128xbf16, #tpu.memory_space<vmem>>, %arg3: memref<1x128xf32, #tpu.memory_space<vmem>>, %arg4: memref<1x128xf32, #tpu.memory_space<vmem>>, %arg5: memref<128x128xbf16, #tpu.memory_space<vmem>>, %arg6: memref<1x128xf32, #tpu.memory_space<vmem>>, %arg7: memref<1x128xf32, #tpu.memory_space<vmem>>, %arg8: memref<128x128xbf16, #tpu.memory_space<vmem>>, %arg9: memref<1x128xf32, #tpu.memory_space<vmem>>, %arg10: memref<1x128xf32, #tpu.memory_space<vmem>>, %arg11: memref<8x128xf32, #tpu.memory_space<vmem>>) attributes {dimension_semantics = [#tpu.dimension_semantics<arbitrary>], iteration_bounds = array<i64: 1>, scalar_prefetch = 0 : i64, scratch_operands = 0 : i64, tpu.core_type = #tpu.core_type<tc>, window_params = [{pipeline_mode = #tpu.pipeline_mode<synchronous>, transform_indices = @transform_0, window_bounds = array<i64: 8, 128>}, {pipeline_mode = #tpu.pipeline_mode<synchronous>, transform_indices = @transform_1, window_bounds = array<i64: 128, 128>}, {pipeline_mode = #tpu.pipeline_mode<synchronous>, transform_indices = @transform_2, window_bounds = array<i64: 1, 128>}, {pipeline_mode = #tpu.pipeline_mode<synchronous>, transform_indices = @transform_3, window_bounds = array<i64: 1, 128>}, {pipeline_mode = #tpu.pipeline_mode<synchronous>, transform_indices = @transform_4, window_bounds = array<i64: 128, 128>}, {pipeline_mode = #tpu.pipeline_mode<synchronous>, transform_indices = @transform_5, window_bounds = array<i64: 1, 128>}, {pipeline_mode = #tpu.pipeline_mode<synchronous>, transform_indices = @transform_6, window_bounds = array<i64: 1, 128>}, {pipeline_mode = #tpu.pipeline_mode<synchronous>, transform_indices = @transform_7, window_bounds = array<i64: 128, 128>}, {pipeline_mode = #tpu.pipeline_mode<synchronous>, transform_indices = @transform_8, window_bounds = array<i64: 1, 128>}, {pipeline_mode = #tpu.pipeline_mode<synchronous>, transform_indices = @transform_9, window_bounds = array<i64: 1, 128>}, {pipeline_mode = #tpu.pipeline_mode<synchronous>, transform_indices = @transform_10, window_bounds = array<i64: 8, 128>}]} {
    %c0 = arith.constant 0 : index
    %c0_0 = arith.constant 0 : index
    %0 = vector.load %arg1[%c0, %c0_0] : memref<8x128xbf16, #tpu.memory_space<vmem>>, vector<8x128xbf16>
    %c0_1 = arith.constant 0 : index
    %c0_2 = arith.constant 0 : index
    %1 = vector.load %arg2[%c0_1, %c0_2] : memref<128x128xbf16, #tpu.memory_space<vmem>>, vector<128x128xbf16>
    %cst = arith.constant dense<0.000000e+00> : vector<8x128xf32>
    %2 = tpu.matmul %0, %1, %cst {dimension_numbers = #tpu.dot_dimension_numbers<[1], [0], [0], [1], [0, 0, 1, 1], [], []>} : vector<8x128xbf16>, vector<128x128xbf16>, vector<8x128xf32> -> vector<8x128xf32>
    %cst_3 = arith.constant dense<0.000000e+00> : vector<128xf32>
    %3 = vector.multi_reduction <add>, %2, %cst_3 [0] : vector<8x128xf32> to vector<128xf32>
    %4 = vector.shape_cast %3 : vector<128xf32> to vector<1x128xf32>
    %cst_4 = arith.constant 8.000000e+00 : f32
    %5 = vector.broadcast %cst_4 : f32 to vector<1x128xf32>
    %6 = arith.divf %4, %5 : vector<1x128xf32>
    %7 = arith.mulf %2, %2 : vector<8x128xf32>
    %cst_5 = arith.constant dense<0.000000e+00> : vector<128xf32>
    %8 = vector.multi_reduction <add>, %7, %cst_5 [0] : vector<8x128xf32> to vector<128xf32>
    %9 = vector.shape_cast %8 : vector<128xf32> to vector<1x128xf32>
    %cst_6 = arith.constant 8.000000e+00 : f32
    %10 = vector.broadcast %cst_6 : f32 to vector<1x128xf32>
    %11 = arith.divf %9, %10 : vector<1x128xf32>
    %12 = arith.mulf %6, %6 : vector<1x128xf32>
    %13 = arith.subf %11, %12 : vector<1x128xf32>
    %cst_7 = arith.constant 0.000000e+00 : f32
    %14 = vector.broadcast %cst_7 : f32 to vector<1x128xf32>
    %15 = arith.maximumf %13, %14 : vector<1x128xf32>
    %c0_8 = arith.constant 0 : index
    %c0_9 = arith.constant 0 : index
    %16 = vector.load %arg3[%c0_8, %c0_9] : memref<1x128xf32, #tpu.memory_space<vmem>>, vector<1x128xf32>
    %cst_10 = arith.constant 9.99999974E-6 : f32
    %17 = vector.broadcast %cst_10 : f32 to vector<1x128xf32>
    %18 = arith.addf %15, %17 : vector<1x128xf32>
    %19 = math.rsqrt %18 : vector<1x128xf32>
    %20 = arith.mulf %16, %19 : vector<1x128xf32>
    %c0_11 = arith.constant 0 : index
    %c0_12 = arith.constant 0 : index
    %21 = vector.load %arg4[%c0_11, %c0_12] : memref<1x128xf32, #tpu.memory_space<vmem>>, vector<1x128xf32>
    %22 = arith.mulf %6, %20 : vector<1x128xf32>
    %23 = arith.subf %21, %22 : vector<1x128xf32>
    %24 = vector.broadcast %20 : vector<1x128xf32> to vector<8x128xf32>
    %25 = arith.mulf %2, %24 : vector<8x128xf32>
    %26 = vector.broadcast %23 : vector<1x128xf32> to vector<8x128xf32>
    %27 = arith.addf %25, %26 : vector<8x128xf32>
    %cst_13 = arith.constant 0.000000e+00 : f32
    %28 = vector.broadcast %cst_13 : f32 to vector<8x128xf32>
    %29 = arith.maximumf %27, %28 : vector<8x128xf32>
    %30 = arith.truncf %29 : vector<8x128xf32> to vector<8x128xbf16>
    %c0_14 = arith.constant 0 : index
    %c0_15 = arith.constant 0 : index
    %31 = vector.load %arg5[%c0_14, %c0_15] : memref<128x128xbf16, #tpu.memory_space<vmem>>, vector<128x128xbf16>
    %cst_16 = arith.constant dense<0.000000e+00> : vector<8x128xf32>
    %32 = tpu.matmul %30, %31, %cst_16 {dimension_numbers = #tpu.dot_dimension_numbers<[1], [0], [0], [1], [0, 0, 1, 1], [], []>} : vector<8x128xbf16>, vector<128x128xbf16>, vector<8x128xf32> -> vector<8x128xf32>
    %cst_17 = arith.constant dense<0.000000e+00> : vector<128xf32>
    %33 = vector.multi_reduction <add>, %32, %cst_17 [0] : vector<8x128xf32> to vector<128xf32>
    %34 = vector.shape_cast %33 : vector<128xf32> to vector<1x128xf32>
    %cst_18 = arith.constant 8.000000e+00 : f32
    %35 = vector.broadcast %cst_18 : f32 to vector<1x128xf32>
    %36 = arith.divf %34, %35 : vector<1x128xf32>
    %37 = arith.mulf %32, %32 : vector<8x128xf32>
    %cst_19 = arith.constant dense<0.000000e+00> : vector<128xf32>
    %38 = vector.multi_reduction <add>, %37, %cst_19 [0] : vector<8x128xf32> to vector<128xf32>
    %39 = vector.shape_cast %38 : vector<128xf32> to vector<1x128xf32>
    %cst_20 = arith.constant 8.000000e+00 : f32
    %40 = vector.broadcast %cst_20 : f32 to vector<1x128xf32>
    %41 = arith.divf %39, %40 : vector<1x128xf32>
    %42 = arith.mulf %36, %36 : vector<1x128xf32>
    %43 = arith.subf %41, %42 : vector<1x128xf32>
    %cst_21 = arith.constant 0.000000e+00 : f32
    %44 = vector.broadcast %cst_21 : f32 to vector<1x128xf32>
    %45 = arith.maximumf %43, %44 : vector<1x128xf32>
    %c0_22 = arith.constant 0 : index
    %c0_23 = arith.constant 0 : index
    %46 = vector.load %arg6[%c0_22, %c0_23] : memref<1x128xf32, #tpu.memory_space<vmem>>, vector<1x128xf32>
    %cst_24 = arith.constant 9.99999974E-6 : f32
    %47 = vector.broadcast %cst_24 : f32 to vector<1x128xf32>
    %48 = arith.addf %45, %47 : vector<1x128xf32>
    %49 = math.rsqrt %48 : vector<1x128xf32>
    %50 = arith.mulf %46, %49 : vector<1x128xf32>
    %c0_25 = arith.constant 0 : index
    %c0_26 = arith.constant 0 : index
    %51 = vector.load %arg7[%c0_25, %c0_26] : memref<1x128xf32, #tpu.memory_space<vmem>>, vector<1x128xf32>
    %52 = arith.mulf %36, %50 : vector<1x128xf32>
    %53 = arith.subf %51, %52 : vector<1x128xf32>
    %54 = vector.broadcast %50 : vector<1x128xf32> to vector<8x128xf32>
    %55 = arith.mulf %32, %54 : vector<8x128xf32>
    %56 = vector.broadcast %53 : vector<1x128xf32> to vector<8x128xf32>
    %57 = arith.addf %55, %56 : vector<8x128xf32>
    %cst_27 = arith.constant 0.000000e+00 : f32
    %58 = vector.broadcast %cst_27 : f32 to vector<8x128xf32>
    %59 = arith.maximumf %57, %58 : vector<8x128xf32>
    %60 = arith.truncf %59 : vector<8x128xf32> to vector<8x128xbf16>
    %c0_28 = arith.constant 0 : index
    %c0_29 = arith.constant 0 : index
    %61 = vector.load %arg8[%c0_28, %c0_29] : memref<128x128xbf16, #tpu.memory_space<vmem>>, vector<128x128xbf16>
    %cst_30 = arith.constant dense<0.000000e+00> : vector<8x128xf32>
    %62 = tpu.matmul %60, %61, %cst_30 {dimension_numbers = #tpu.dot_dimension_numbers<[1], [0], [0], [1], [0, 0, 1, 1], [], []>} : vector<8x128xbf16>, vector<128x128xbf16>, vector<8x128xf32> -> vector<8x128xf32>
    %cst_31 = arith.constant dense<0.000000e+00> : vector<128xf32>
    %63 = vector.multi_reduction <add>, %62, %cst_31 [0] : vector<8x128xf32> to vector<128xf32>
    %64 = vector.shape_cast %63 : vector<128xf32> to vector<1x128xf32>
    %cst_32 = arith.constant 8.000000e+00 : f32
    %65 = vector.broadcast %cst_32 : f32 to vector<1x128xf32>
    %66 = arith.divf %64, %65 : vector<1x128xf32>
    %67 = arith.mulf %62, %62 : vector<8x128xf32>
    %cst_33 = arith.constant dense<0.000000e+00> : vector<128xf32>
    %68 = vector.multi_reduction <add>, %67, %cst_33 [0] : vector<8x128xf32> to vector<128xf32>
    %69 = vector.shape_cast %68 : vector<128xf32> to vector<1x128xf32>
    %cst_34 = arith.constant 8.000000e+00 : f32
    %70 = vector.broadcast %cst_34 : f32 to vector<1x128xf32>
    %71 = arith.divf %69, %70 : vector<1x128xf32>
    %72 = arith.mulf %66, %66 : vector<1x128xf32>
    %73 = arith.subf %71, %72 : vector<1x128xf32>
    %cst_35 = arith.constant 0.000000e+00 : f32
    %74 = vector.broadcast %cst_35 : f32 to vector<1x128xf32>
    %75 = arith.maximumf %73, %74 : vector<1x128xf32>
    %c0_36 = arith.constant 0 : index
    %c0_37 = arith.constant 0 : index
    %76 = vector.load %arg9[%c0_36, %c0_37] : memref<1x128xf32, #tpu.memory_space<vmem>>, vector<1x128xf32>
    %cst_38 = arith.constant 9.99999974E-6 : f32
    %77 = vector.broadcast %cst_38 : f32 to vector<1x128xf32>
    %78 = arith.addf %75, %77 : vector<1x128xf32>
    %79 = math.rsqrt %78 : vector<1x128xf32>
    %80 = arith.mulf %76, %79 : vector<1x128xf32>
    %c0_39 = arith.constant 0 : index
    %c0_40 = arith.constant 0 : index
    %81 = vector.load %arg10[%c0_39, %c0_40] : memref<1x128xf32, #tpu.memory_space<vmem>>, vector<1x128xf32>
    %82 = arith.mulf %66, %80 : vector<1x128xf32>
    %83 = arith.subf %81, %82 : vector<1x128xf32>
    %84 = vector.broadcast %80 : vector<1x128xf32> to vector<8x128xf32>
    %85 = arith.mulf %62, %84 : vector<8x128xf32>
    %86 = vector.broadcast %83 : vector<1x128xf32> to vector<8x128xf32>
    %87 = arith.addf %85, %86 : vector<8x128xf32>
    %c0_41 = arith.constant 0 : index
    %c0_42 = arith.constant 0 : index
    %88 = vector.load %arg11[%c0_41, %c0_42] : memref<8x128xf32, #tpu.memory_space<vmem>>, vector<8x128xf32>
    tpu.vector_store %arg11[%c0_41, %c0_42], %87 {strides = array<i32>} : memref<8x128xf32, #tpu.memory_space<vmem>>, vector<8x128xf32>,
    return
  }
  func.func @transform_0(%arg0: i32) -> (i32, i32) {
    %c0_i32 = arith.constant 0 : i32
    %c0_i32_0 = arith.constant 0 : i32
    %c0_i32_1 = arith.constant 0 : i32
    return %c0_i32, %c0_i32_0 : i32, i32
  }
  func.func @transform_1(%arg0: i32) -> (i32, i32) {
    %c0_i32 = arith.constant 0 : i32
    %c0_i32_0 = arith.constant 0 : i32
    %c0_i32_1 = arith.constant 0 : i32
    return %c0_i32, %c0_i32_0 : i32, i32
  }
  func.func @transform_2(%arg0: i32) -> (i32, i32) {
    %c0_i32 = arith.constant 0 : i32
    %c0_i32_0 = arith.constant 0 : i32
    %c0_i32_1 = arith.constant 0 : i32
    return %c0_i32, %c0_i32_0 : i32, i32
  }
  func.func @transform_3(%arg0: i32) -> (i32, i32) {
    %c0_i32 = arith.constant 0 : i32
    %c0_i32_0 = arith.constant 0 : i32
    %c0_i32_1 = arith.constant 0 : i32
    return %c0_i32, %c0_i32_0 : i32, i32
  }
  func.func @transform_4(%arg0: i32) -> (i32, i32) {
    %c0_i32 = arith.constant 0 : i32
    %c0_i32_0 = arith.constant 0 : i32
    %c0_i32_1 = arith.constant 0 : i32
    return %c0_i32, %c0_i32_0 : i32, i32
  }
  func.func @transform_5(%arg0: i32) -> (i32, i32) {
    %c0_i32 = arith.constant 0 : i32
    %c0_i32_0 = arith.constant 0 : i32
    %c0_i32_1 = arith.constant 0 : i32
    return %c0_i32, %c0_i32_0 : i32, i32
  }
  func.func @transform_6(%arg0: i32) -> (i32, i32) {
    %c0_i32 = arith.constant 0 : i32
    %c0_i32_0 = arith.constant 0 : i32
    %c0_i32_1 = arith.constant 0 : i32
    return %c0_i32, %c0_i32_0 : i32, i32
  }
  func.func @transform_7(%arg0: i32) -> (i32, i32) {
    %c0_i32 = arith.constant 0 : i32
    %c0_i32_0 = arith.constant 0 : i32
    %c0_i32_1 = arith.constant 0 : i32
    return %c0_i32, %c0_i32_0 : i32, i32
  }
  func.func @transform_8(%arg0: i32) -> (i32, i32) {
    %c0_i32 = arith.constant 0 : i32
    %c0_i32_0 = arith.constant 0 : i32
    %c0_i32_1 = arith.constant 0 : i32
    return %c0_i32, %c0_i32_0 : i32, i32
  }
  func.func @transform_9(%arg0: i32) -> (i32, i32) {
    %c0_i32 = arith.constant 0 : i32
    %c0_i32_0 = arith.constant 0 : i32
    %c0_i32_1 = arith.constant 0 : i32
    return %c0_i32, %c0_i32_0 : i32, i32
  }
  func.func @transform_10(%arg0: i32) -> (i32, i32) {
    %c0_i32 = arith.constant 0 : i32
    %c0_i32_0 = arith.constant 0 : i32
    %c0_i32_1 = arith.constant 0 : i32
    return %c0_i32, %c0_i32_0 : i32, i32
  }
}

</mosaic_0001>

<bundles_post_ra>
// kernel: tpu_custom_call.1
= control target key start
LH: loop header
LB: loop body
LE: loop exit
PB: predicated region body
PF: predicated region fallthrough
CT: control target
= control target key end

     0   :  { %15 = vsyncpa [#allocation3], 0  ;;  %s1000_s0 = inlined_call_operand.hbm [shape: bf16[8,128], index: 0, kind: input, shape index: {}]   ;;  %s1001_s1 = inlined_call_operand.hbm [shape: bf16[128,128], index: 1, kind: input, shape index: {}]   ;;  %s1002_s2 = inlined_call_operand.vmem [shape: f32[1,128], index: 2, kind: input, shape index: {}]   ;;  %s1003_s3 = inlined_call_operand.vmem [shape: f32[1,128], index: 3, kind: input, shape index: {}]   ;;  %s1004_s4 = inlined_call_operand.hbm [shape: bf16[128,128], index: 4, kind: input, shape index: {}]   ;;  %s1005_s5 = inlined_call_operand.vmem [shape: f32[1,128], index: 5, kind: input, shape index: {}]   ;;  %s1006_s6 = inlined_call_operand.vmem [shape: f32[1,128], index: 6, kind: input, shape index: {}]   ;;  %s1007_s7 = inlined_call_operand.hbm [shape: bf16[128,128], index: 7, kind: input, shape index: {}]   ;;  %s1008_s8 = inlined_call_operand.vmem [shape: f32[1,128], index: 8, kind: input, shape index: {}]   ;;  %s1009_s9 = inlined_call_operand.vmem [shape: f32[1,128], index: 9, kind: input, shape index: {}]   ;;  %s1010_s10 = inlined_call_operand.hbm [shape: f32[8,128], index: 10, kind: output, shape index: {}]  }
   0x1   :  { %16 = vsyncpa [#allocation6], 0 }
   0x2   :  { %17 = vsyncpa [#allocation9], 0 }
   0x3   :  { %18 = vsyncpa [#allocation4], 0  ;;  %s811_s13 = smov [#allocation5]   ;;  %s693_s17 = scalar_lea.hbm %s1001_s1, 1024 }
   0x4   :  { %s34_s14 = sshll.u32 %s811_s13, 4  ;;  %p694_p0 = scmp.ne.s32.totalorder %s1001_s1, %s693_s17  ;;  %s35_s14 = int_to_ptr.vmem [resolvable:$true] %s34_s14 }
   0x5   :  { %p697_p1 = scmp.lt.u32.totalorder %s693_s17, %s1001_s1 }
   0x7   :  { %p699_p2 = pnand %p697_p1, %p694_p0 }
   0x9   :  { %702 = shalt.err (!%p699_p2)
}
   0xa   :  { %s703_s22 = scalar_lea.vmem %s35_s14, 1024  ;;  %p708_p4 = scmp.lt.s32.totalorder %s35_s14, %s35_s14 }
   0xb   :  { %p704_p3 = scmp.ne.s32.totalorder %s35_s14, %s703_s22  ;;  %p709_p5 = scmp.lt.s32.totalorder %s703_s22, %s703_s22 }
   0xd   :  { %p710_p6 = por %p709_p5, %p708_p4 }
   0xf   :  { %p711_p7 = pnand %p710_p6, %p704_p3 }
  0x11   :  { %714 = shalt.err (!%p711_p7)
}
  0x12   :  { %s812_s23 = smov 64   ;;  %s813_s24 = smov 4  }
  0x13   :  { %40 = dma.hbm_to_vmem [thread:$0]  %s1001_s1, 1024, %s35_s14, [#allocation6], %s812_s23, %s812_s23, %s813_s24  }
  0x14   :  { %s814_s27 = smov [#allocation2]   ;;  %s815_s29 = smov [#allocation7]  }
  0x15   :  { %s25_s28 = sshll.u32 %s814_s27, 4  ;;  %s50_s30 = sshll.u32 %s815_s29, 4  ;;  %s26_s28 = int_to_ptr.vmem [resolvable:$true] %s25_s28  ;;  %s51_s30 = int_to_ptr.vmem [resolvable:$true] %s50_s30 }
  0x16   :  { %s715_s13 = scalar_lea.hbm %s1000_s0, 64 }
  0x17   :  { %p716_p8 = scmp.ne.s32.totalorder %s1000_s0, %s715_s13  ;;  %p719_p9 = scmp.lt.u32.totalorder %s715_s13, %s1000_s0 }
  0x19   :  { %p721_p10 = pnand %p719_p9, %p716_p8 }
  0x1b   :  { %724 = shalt.err (!%p721_p10)
}
  0x1c   :  { %s725_s1 = scalar_lea.vmem %s26_s28, 64  ;;  %p730_p12 = scmp.lt.s32.totalorder %s26_s28, %s26_s28 }
  0x1d   :  { %p726_p11 = scmp.ne.s32.totalorder %s26_s28, %s725_s1  ;;  %p731_p13 = scmp.lt.s32.totalorder %s725_s1, %s725_s1 }
  0x1f   :  { %p732_p0 = por %p731_p13, %p730_p12 }
  0x21   :  { %p733_p1 = pnand %p732_p0, %p726_p11 }
  0x23   :  { %736 = shalt.err (!%p733_p1)
}
  0x24   :  { %28 = dma.hbm_to_vmem [thread:$0]  %s1000_s0, 64, %s26_s28, [#allocation3]  }
  0x25   :  { %s737_s22 = scalar_lea.hbm %s1004_s4, 1024 }
  0x26   :  { %p738_p2 = scmp.ne.s32.totalorder %s1004_s4, %s737_s22  ;;  %p741_p3 = scmp.lt.u32.totalorder %s737_s22, %s1004_s4 }
  0x28   :  { %p743_p4 = pnand %p741_p3, %p738_p2 }
  0x2a   :  { %746 = shalt.err (!%p743_p4)
}
  0x2b   :  { %s747_s11 = scalar_lea.vmem %s51_s30, 1024  ;;  %p752_p6 = scmp.lt.s32.totalorder %s51_s30, %s51_s30 }
  0x2c   :  { %p748_p5 = scmp.ne.s32.totalorder %s51_s30, %s747_s11  ;;  %p753_p7 = scmp.lt.s32.totalorder %s747_s11, %s747_s11 }
  0x2e   :  { %p754_p8 = por %p753_p7, %p752_p6 }
  0x30   :  { %p755_p9 = pnand %p754_p8, %p748_p5 }
  0x32   :  { %758 = shalt.err (!%p755_p9)
}
  0x33   :  { %56 = dma.hbm_to_vmem [thread:$0]  %s1004_s4, 1024, %s51_s30, [#allocation6], %s812_s23, %s812_s23, %s813_s24  }
  0x34   :  { %s816_s12 = smov [#allocation8]   ;;  %s759_s17 = scalar_lea.hbm %s1007_s7, 1024 }
  0x35   :  { %s66_s13 = sshll.u32 %s816_s12, 4  ;;  %p760_p10 = scmp.ne.s32.totalorder %s1007_s7, %s759_s17  ;;  %s67_s13 = int_to_ptr.vmem [resolvable:$true] %s66_s13 }
  0x36   :  { %p763_p11 = scmp.lt.u32.totalorder %s759_s17, %s1007_s7 }
  0x38   :  { %p765_p12 = pnand %p763_p11, %p760_p10 }
  0x3a   :  { %768 = shalt.err (!%p765_p12)
}
  0x3b   :  { %s769_s20 = scalar_lea.vmem %s67_s13, 1024  ;;  %p774_p0 = scmp.lt.s32.totalorder %s67_s13, %s67_s13 }
  0x3c   :  { %p770_p13 = scmp.ne.s32.totalorder %s67_s13, %s769_s20  ;;  %p775_p1 = scmp.lt.s32.totalorder %s769_s20, %s769_s20 }
  0x3e   :  { %p776_p2 = por %p775_p1, %p774_p0 }
  0x40   :  { %p777_p3 = pnand %p776_p2, %p770_p13 }
  0x42   :  { %780 = shalt.err (!%p777_p3)
}
  0x43   :  { %72 = dma.hbm_to_vmem [thread:$0]  %s1007_s7, 1024, %s67_s13, [#allocation9], %s812_s23, %s812_s23, %s813_s24  }
  0x44   :  { %803 = dma.done.wait [#allocation3], 64  }
  0x45   :  { %804 = vsyncadd [#allocation3], 4294967232 }
  0x46   :  { %805 = dma.done.wait [#allocation6], 2048  }
  0x47   :  { %806 = vsyncadd [#allocation6], 4294965248 }
  0x48   :  { %807 = dma.done.wait [#allocation9], 1024  }
  0x49   :  { %808 = vsyncadd [#allocation9], 4294966272  ;;  %v817_v0 = vmov 0.0   ;;  %vm818_vm0 = vmmov 0   ;;  %v663_v1 = vld [vmem:[#allocation5] sm:$0xff]   ;;  %v664_v2 = vld [vmem:[#allocation5 + $0x8] sm:$0xff]   ;;  %v222_v41 = vlaneseq }
  0x4a   :  { %594 = vmatprep.subr.bf16.mxu0 %v817_v0  ;;  %610 = vmatprep.mubr.msk.bf16.mxu0 %vm818_vm0, %v817_v0  ;;  %v665_v3 = vld [vmem:[#allocation5 + $0x10] sm:$0xff]   ;;  %v666_v4 = vld [vmem:[#allocation5 + $0x18] sm:$0xff]   ;;  %v667_v5 = vld [vmem:[#allocation5 + $0x20] sm:$0xff]   ;;  %s819_s29 = smov [#allocation10]  }
  0x4b   :  { %614 = vmatprep.subr.bf16.mxu1 %v817_v0  ;;  %630 = vmatprep.mubr.msk.bf16.mxu1 %vm818_vm0, %v817_v0  ;;  %v668_v6 = vld [vmem:[#allocation5 + $0x28] sm:$0xff]   ;;  %v669_v7 = vld [vmem:[#allocation5 + $0x30] sm:$0xff]   ;;  %v670_v8 = vld [vmem:[#allocation5 + $0x38] sm:$0xff]   ;;  %v223_v42 = vshrl.u32 %v222_v41, 7  ;;  %s532_s11 = sshll.u32 %s819_s29, 4  ;;  %s533_s11 = int_to_ptr.vmem [resolvable:$true] %s532_s11 }
  0x4c   :  { %595 = vmatpush3.bf16.msra.mxu0 %v663_v1  ;;  %v90_v9 = vld [vmem:[#allocation2] sm:$0xf]  ;;  %v671_v10 = vld [vmem:[#allocation7] sm:$0xff]   ;;  %v672_v11 = vld [vmem:[#allocation7 + $0x8] sm:$0xff]   ;;  %s781_s0 = scalar_lea.vmem %s533_s11, 128  ;;  %p786_p5 = scmp.lt.s32.totalorder %s533_s11, %s533_s11 }
  0x4d   :  { %596 = vmatprep.subr.bf16.mxu0 %v817_v0  ;;  %615 = vmatpush3.bf16.msra.mxu1 %v671_v10  ;;  %v673_v12 = vld [vmem:[#allocation7 + $0x10] sm:$0xff]   ;;  %v674_v13 = vld [vmem:[#allocation7 + $0x18] sm:$0xff]   ;;  %v675_v14 = vld [vmem:[#allocation7 + $0x20] sm:$0xff]   ;;  %v958_v44 = vsub.s32 0, %v223_v42  ;;  %p782_p4 = scmp.ne.s32.totalorder %s533_s11, %s781_s0  ;;  %p787_p6 = scmp.lt.s32.totalorder %s781_s0, %s781_s0 }
  0x4e   :  { %616 = vmatprep.subr.bf16.mxu1 %v817_v0  ;;  %v676_v15 = vld [vmem:[#allocation7 + $0x28] sm:$0xff]   ;;  %v677_v16 = vld [vmem:[#allocation7 + $0x30] sm:$0xff]   ;;  %v678_v17 = vld [vmem:[#allocation7 + $0x38] sm:$0xff]  }
  0x4f   :  { %v214_v43 = vld [vmem:[%s1002_s2] sm:$0x1]  ;;  %v679_v56 = vld [vmem:[#allocation8] sm:$0xff]   ;;  %v680_v57 = vld [vmem:[#allocation8 + $0x8] sm:$0xff]   ;;  %p788_p7 = por %p787_p6, %p786_p5 }
  0x50   :  { %597 = vmatpush3.bf16.msra.mxu0 %v664_v2  ;;  %v218_v47 = vld [vmem:[%s1003_s3] sm:$0x1]  ;;  %v681_v58 = vld [vmem:[#allocation8 + $0x10] sm:$0xff]   ;;  %v683_v60 = vld [vmem:[#allocation8 + $0x20] sm:$0xff]  }
  0x51   :  { %598 = vmatprep.subr.bf16.mxu0 %v817_v0  ;;  %617 = vmatpush3.bf16.msra.mxu1 %v672_v11  ;;  %v682_v59 = vld [vmem:[#allocation8 + $0x18] sm:$0xff]   ;;  %v684_v61 = vld [vmem:[#allocation8 + $0x28] sm:$0xff]   ;;  %v685_v62 = vld [vmem:[#allocation8 + $0x30] sm:$0xff]   ;;  %p789_p8 = pnand %p788_p7, %p782_p4 }
  0x52   :  { %618 = vmatprep.subr.bf16.mxu1 %v817_v0  ;;  %v686_v63 = vld [vmem:[#allocation8 + $0x38] sm:$0xff]  }
  0x54   :  { %599 = vmatpush3.bf16.msra.mxu0 %v665_v3 }
  0x55   :  { %600 = vmatprep.subr.bf16.mxu0 %v817_v0  ;;  %619 = vmatpush3.bf16.msra.mxu1 %v673_v12 }
  0x56   :  { %620 = vmatprep.subr.bf16.mxu1 %v817_v0 }
  0x58   :  { %601 = vmatpush3.bf16.msra.mxu0 %v666_v4 }
  0x59   :  { %602 = vmatprep.subr.bf16.mxu0 %v817_v0  ;;  %621 = vmatpush3.bf16.msra.mxu1 %v674_v13 }
  0x5a   :  { %622 = vmatprep.subr.bf16.mxu1 %v817_v0 }
  0x5c   :  { %603 = vmatpush3.bf16.msra.mxu0 %v667_v5 }
  0x5d   :  { %604 = vmatprep.subr.bf16.mxu0 %v817_v0  ;;  %623 = vmatpush3.bf16.msra.mxu1 %v675_v14 }
  0x5e   :  { %624 = vmatprep.subr.bf16.mxu1 %v817_v0 }
  0x60   :  { %605 = vmatpush3.bf16.msra.mxu0 %v668_v6 }
  0x61   :  { %606 = vmatprep.subr.bf16.mxu0 %v817_v0  ;;  %625 = vmatpush3.bf16.msra.mxu1 %v676_v15 }
  0x62   :  { %626 = vmatprep.subr.bf16.mxu1 %v817_v0 }
  0x64   :  { %607 = vmatpush3.bf16.msra.mxu0 %v669_v7 }
  0x65   :  { %608 = vmatprep.subr.bf16.mxu0 %v817_v0  ;;  %627 = vmatpush3.bf16.msra.mxu1 %v677_v16 }
  0x66   :  { %628 = vmatprep.subr.bf16.mxu1 %v817_v0 }
  0x68   :  { %609 = vmatpush3.bf16.msra.mxu0 %v670_v8 }
  0x69   :  { %634 = vmatprep.subr.bf16.mxu0 %v817_v0  ;;  %629 = vmatpush3.bf16.msra.mxu1 %v678_v17 }
  0x6b   :  { %611 = vmatmul.mubr.bf16.vlgmr.msra.gmra.mrb[0].mxu0 %v90_v9 }
  0x6c   :  { %650 = vmatprep.mubr.msk.bf16.mxu0 %vm818_vm0, %v817_v0  ;;  %635 = vmatpush3.bf16.msra.mxu0 %v679_v56 }
  0x6d   :  { %636 = vmatprep.subr.bf16.mxu0 %v817_v0 }
  0x70   :  { %637 = vmatpush3.bf16.msra.mxu0 %v680_v57 }
  0x71   :  { %638 = vmatprep.subr.bf16.mxu0 %v817_v0 }
  0x74   :  { %639 = vmatpush3.bf16.msra.mxu0 %v681_v58 }
  0x75   :  { %640 = vmatprep.subr.bf16.mxu0 %v817_v0 }
  0x78   :  { %641 = vmatpush3.bf16.msra.mxu0 %v682_v59  ;;  %v504_v59 = vld [vmem:[%s1008_s8] sm:$0x1] }
  0x79   :  { %642 = vmatprep.subr.bf16.mxu0 %v817_v0 }
  0x7c   :  { %643 = vmatpush3.bf16.msra.mxu0 %v683_v60 }
  0x7d   :  { %644 = vmatprep.subr.bf16.mxu0 %v817_v0 }
  0x80   :  { %645 = vmatpush3.bf16.msra.mxu0 %v684_v61 }
  0x81   :  { %646 = vmatprep.subr.bf16.mxu0 %v817_v0 }
  0x84   :  { %647 = vmatpush3.bf16.msra.mxu0 %v685_v62  ;;  %v508_v62 = vld [vmem:[%s1009_s9] sm:$0x1] }
  0x85   :  { %648 = vmatprep.subr.bf16.mxu0 %v817_v0 }
  0x88   :  { %649 = vmatpush3.bf16.msra.mxu0 %v686_v63 }
 0x13e   :  { %v189_v18 = vpop.f32.mrb[0].mxu0 }
 0x13f   :  { %v195_v19 = vrot.slane %v189_v18, 4  ;;  %v203_v20 = vmul.f32 %v189_v18, %v189_v18  ;;  %v612_v21 = vpop.f32.mrb[1].mxu0 }
 0x140   :  { %v192_v22 = vpop.f32.mrb[2].mxu0 }
 0x141   :  { %v196_v23 = vadd.f32 %v195_v19, %v189_v18  ;;  %v204_v24 = vrot.slane %v203_v20, 4  ;;  %v613_v25 = vpop.f32.mrb[3].mxu0 }
 0x143   :  { %v197_v26 = vrot.slane %v196_v23, 2  ;;  %v205_v27 = vadd.f32 %v204_v24, %v203_v20 }
 0x145   :  { %v198_v28 = vadd.f32 %v197_v26, %v196_v23  ;;  %v206_v29 = vrot.slane %v205_v27, 2  ;;  %v359_v23 = vld [vmem:[%s1005_s5] sm:$0x1] }
 0x146   :  { %v363_v26 = vld [vmem:[%s1006_s6] sm:$0x1] }
 0x147   :  { %v199_v30 = vrot.slane %v198_v28, 1  ;;  %v207_v31 = vadd.f32 %v206_v29, %v205_v27 }
 0x149   :  { %v200_v32 = vadd.f32 %v199_v30, %v198_v28  ;;  %v208_v33 = vrot.slane %v207_v31, 1 }
 0x14b   :  { %v202_v34 = vmul.f32 0.125, %v200_v32  ;;  %v209_v35 = vadd.f32 %v208_v33, %v207_v31 }
 0x14d   :  { %v210_v36 = vmul.f32 0.125, %v209_v35  ;;  %v211_v37 = vmul.f32 %v202_v34, %v202_v34 }
 0x14f   :  { %v212_v38 = vsub.f32 %v210_v36, %v211_v37 }
 0x151   :  { %v213_v39 = vmax.f32 %v212_v38, 0.0 }
 0x153   :  { %v215_v40 = vadd.f32 1e-05, %v213_v39 }
 0x155   :  { %687 = vrsqrt.f32 %v215_v40 }
 0x15f   :  { %v688_v45 = vpop.eup %687 }
 0x160   :  { %v217_v46 = vmul.f32 %v688_v45, %v214_v43 }
 0x162   :  { %v225_v48 = vrot.slane %v217_v46, %v958_v44  ;;  %v219_v49 = vmul.f32 %v217_v46, %v202_v34 }
 0x164   :  { %v220_v50 = vsub.f32 %v218_v47, %v219_v49  ;;  %v227_v51 = vmul.f32 %v225_v48, %v189_v18 }
 0x166   :  { %v232_v52 = vrot.slane %v220_v50, %v958_v44 }
 0x168   :  { %v234_v53 = vadd.f32 %v232_v52, %v227_v51 }
 0x16a   :  { %v235_v54 = vmax.f32 %v234_v53, 0.0 }
 0x16c   :  { %v236_v55 = vpack.c.bf16 %v235_v54, %v235_v54 }
 0x16e   :  { %631 = vmatmul.mubr.bf16.vlgmr.msra.gmra.mrb[0].mxu1 %v236_v55 }
 0x241   :  { %v335_v1 = vpop.f32.mrb[0].mxu1 }
 0x242   :  { %v341_v2 = vrot.slane %v335_v1, 4  ;;  %v348_v3 = vmul.f32 %v335_v1, %v335_v1  ;;  %v632_v4 = vpop.f32.mrb[1].mxu1 }
 0x243   :  { %v338_v5 = vpop.f32.mrb[2].mxu1 }
 0x244   :  { %v342_v6 = vadd.f32 %v341_v2, %v335_v1  ;;  %v349_v7 = vrot.slane %v348_v3, 4  ;;  %v633_v8 = vpop.f32.mrb[3].mxu1 }
 0x246   :  { %v343_v9 = vrot.slane %v342_v6, 2  ;;  %v350_v10 = vadd.f32 %v349_v7, %v348_v3 }
 0x248   :  { %v344_v11 = vadd.f32 %v343_v9, %v342_v6  ;;  %v351_v12 = vrot.slane %v350_v10, 2 }
 0x24a   :  { %v345_v13 = vrot.slane %v344_v11, 1  ;;  %v352_v14 = vadd.f32 %v351_v12, %v350_v10 }
 0x24c   :  { %v346_v15 = vadd.f32 %v345_v13, %v344_v11  ;;  %v353_v16 = vrot.slane %v352_v14, 1 }
 0x24e   :  { %v347_v17 = vmul.f32 0.125, %v346_v15  ;;  %v354_v0 = vadd.f32 %v353_v16, %v352_v14 }
 0x250   :  { %v355_v18 = vmul.f32 0.125, %v354_v0  ;;  %v356_v19 = vmul.f32 %v347_v17, %v347_v17 }
 0x252   :  { %v357_v20 = vsub.f32 %v355_v18, %v356_v19 }
 0x254   :  { %v358_v21 = vmax.f32 %v357_v20, 0.0 }
 0x256   :  { %v360_v22 = vadd.f32 1e-05, %v358_v21 }
 0x258   :  { %689 = vrsqrt.f32 %v360_v22 }
 0x262   :  { %v690_v24 = vpop.eup %689 }
 0x263   :  { %v362_v25 = vmul.f32 %v690_v24, %v359_v23 }
 0x265   :  { %v364_v27 = vmul.f32 %v362_v25, %v347_v17  ;;  %v370_v28 = vrot.slane %v362_v25, %v958_v44 }
 0x267   :  { %v365_v29 = vsub.f32 %v363_v26, %v364_v27  ;;  %v372_v30 = vmul.f32 %v370_v28, %v335_v1 }
 0x269   :  { %v377_v31 = vrot.slane %v365_v29, %v958_v44 }
 0x26b   :  { %v379_v32 = vadd.f32 %v377_v31, %v372_v30 }
 0x26d   :  { %v380_v33 = vmax.f32 %v379_v32, 0.0 }
 0x26f   :  { %v381_v34 = vpack.c.bf16 %v380_v33, %v380_v33 }
 0x271   :  { %651 = vmatmul.mubr.bf16.vlgmr.msra.gmra.mrb[4].mxu0 %v381_v34 }
 0x344   :  { %v480_v35 = vpop.f32.mrb[4].mxu0 }
 0x345   :  { %v486_v36 = vrot.slane %v480_v35, 4  ;;  %v493_v37 = vmul.f32 %v480_v35, %v480_v35  ;;  %v652_v38 = vpop.f32.mrb[5].mxu0 }
 0x346   :  { %v483_v39 = vpop.f32.mrb[6].mxu0 }
 0x347   :  { %v487_v40 = vadd.f32 %v486_v36, %v480_v35  ;;  %v494_v41 = vrot.slane %v493_v37, 4  ;;  %v653_v42 = vpop.f32.mrb[7].mxu0 }
 0x349   :  { %v488_v43 = vrot.slane %v487_v40, 2  ;;  %v495_v45 = vadd.f32 %v494_v41, %v493_v37 }
 0x34b   :  { %v489_v46 = vadd.f32 %v488_v43, %v487_v40  ;;  %v496_v47 = vrot.slane %v495_v45, 2 }
 0x34d   :  { %v490_v48 = vrot.slane %v489_v46, 1  ;;  %v497_v49 = vadd.f32 %v496_v47, %v495_v45 }
 0x34f   :  { %v491_v50 = vadd.f32 %v490_v48, %v489_v46  ;;  %v498_v51 = vrot.slane %v497_v49, 1 }
 0x351   :  { %v492_v52 = vmul.f32 0.125, %v491_v50  ;;  %v499_v53 = vadd.f32 %v498_v51, %v497_v49 }
 0x353   :  { %v500_v54 = vmul.f32 0.125, %v499_v53  ;;  %v501_v55 = vmul.f32 %v492_v52, %v492_v52 }
 0x355   :  { %v502_v56 = vsub.f32 %v500_v54, %v501_v55 }
 0x357   :  { %v503_v57 = vmax.f32 %v502_v56, 0.0 }
 0x359   :  { %v505_v58 = vadd.f32 1e-05, %v503_v57 }
 0x35b   :  { %691 = vrsqrt.f32 %v505_v58 }
 0x365   :  { %v692_v60 = vpop.eup %691 }
 0x366   :  { %v507_v61 = vmul.f32 %v692_v60, %v504_v59 }
 0x368   :  { %v509_v63 = vmul.f32 %v507_v61, %v492_v52  ;;  %v515_v1 = vrot.slane %v507_v61, %v958_v44 }
 0x36a   :  { %v510_v2 = vsub.f32 %v508_v62, %v509_v63  ;;  %v517_v3 = vmul.f32 %v515_v1, %v480_v35 }
 0x36c   :  { %v522_v4 = vrot.slane %v510_v2, %v958_v44 }
 0x36e   :  { %v524_v5 = vadd.f32 %v522_v4, %v517_v3 }
 0x370   :  { %525 = vst [vmem:[#allocation10] sm:$0xff] %v524_v5 }
 0x371   :  { %792 = shalt.err (!%p789_p8)
}
 0x372   :  { %s793_s28 = scalar_lea.hbm %s1010_s10, 128 }
 0x373   :  { %p794_p9 = scmp.ne.s32.totalorder %s1010_s10, %s793_s28  ;;  %p797_p10 = scmp.lt.u32.totalorder %s793_s28, %s1010_s10 }
 0x375   :  { %p799_p11 = pnand %p797_p10, %p794_p9 }
 0x377   :  { %802 = shalt.err (!%p799_p11)
}
 0x378   :  { %535 = dma.vmem_to_hbm [thread:$0]  %s533_s11, 128, %s1010_s10, [#allocation4]  }
 0x379   :  { %809 = dma.done.wait [#allocation4], 128  }
 0x37a   :  { %810 = vsyncadd [#allocation4], 4294967168 }
 0x37b   :  { %539 = vsyncpa [#allocation3], 1 }
 0x37c   :  { %540 = vsyncpa [#allocation6], 1 }
 0x37d   :  { %541 = vsyncpa [#allocation9], 1 }
 0x37e   :  { %542 = vsyncpa [#allocation4], 1 }

</bundles_post_ra>
